<compile_context>
chip_gen: v5e
topology: v5e:2x2
jax: 0.10.0
libtpu: 0.0.40
codegen_flags: <defaults>
</compile_context>

<pallas_src>
import functools
import math

import jax
import jax.numpy as jnp
from jax.experimental import pallas as pl
from jax.experimental.pallas import tpu as pltpu


def _attention_kernel(x_ref, w_ref, b_ref, o_ref, num_acc, den_acc, *, cp):
    # x_ref:   (BB, tT, Cin)   block of batch rows x block of time steps
    # w_ref:   (Cin, 2*Cp)     fused [att | cla] 1x1-conv weights
    # b_ref:   (1, 2*Cp)       fused biases
    # o_ref:   (BB, Cp)        pooled output (written at last T tile)
    # num_acc: (BB, Cp)        running sum_T(att * cla)
    # den_acc: (BB, Cp)        running sum_T(att)
    t = pl.program_id(1)

    @pl.when(t == 0)
    def _init():
        num_acc[...] = jnp.zeros_like(num_acc)
        den_acc[...] = jnp.zeros_like(den_acc)

    bb, tt, cin = x_ref.shape
    x2 = x_ref[...].reshape(bb * tt, cin)                       # (BB*tT, Cin)

    # single fused projection for both heads (one MXU pass, 2*Cp wide)
    y = jnp.dot(x2, w_ref[...], preferred_element_type=jnp.float32) + b_ref[...]
    y = jax.nn.sigmoid(y)                                       # (BB*tT, 2*Cp)

    eps = 1e-07
    att = jnp.clip(y[:, :cp], eps, 1.0 - eps)                   # (BB*tT, Cp)
    cla = y[:, cp:]                                             # (BB*tT, Cp)

    # accumulate the two T-reductions (no per-element divide needed)
    den_acc[...] += jnp.sum(att.reshape(bb, tt, cp), axis=1)
    num_acc[...] += jnp.sum((att * cla).reshape(bb, tt, cp), axis=1)

    @pl.when(t == pl.num_programs(1) - 1)
    def _finalize():
        out = num_acc[...] / den_acc[...]                       # tiny (BB, Cp) divide
        o_ref[...] = jnp.clip(out, 0.0, 1.0).astype(o_ref.dtype)  # hardtanh(0, 1)


def _round_up(x, m):
    return (x + m - 1) // m * m


def _pick_t_tile(T, max_tile=512):
    """Largest divisor of T that is <= max_tile and sublane-aligned (or T itself)."""
    if T <= max_tile:
        return T
    for tt in range(max_tile, 7, -1):
        if T % tt == 0 and tt % 8 == 0:
            return tt
    return T


def attention_forward(x_nchw, wa, ba, wc, bc, *, block_b=8):
    """x_nchw: (B, n_in, T, 1) float32; wa/wc: (n_out, n_in, 1, 1); ba/bc: (n_out,)."""
    B, Cin, T, _ = x_nchw.shape
    Cout = wa.shape[0]

    # ---- host-side layout glue (plain JAX) ----
    x_btc = jnp.transpose(x_nchw[:, :, :, 0], (0, 2, 1))        # (B, T, Cin)

    BB = min(block_b, _round_up(B, 8))     # batch rows per grid step
    B_pad = _round_up(B, BB)
    Cp = _round_up(Cout, 128)              # lane-dense / v5e-friendly output width
    tT = _pick_t_tile(T)

    if B_pad != B:
        x_btc = jnp.pad(x_btc, ((0, B_pad - B), (0, 0), (0, 0)))

    def _prep(w, b):
        w2 = w[:, :, 0, 0]                                      # (Cout, Cin)
        wp = jnp.zeros((Cp, Cin), w2.dtype).at[:Cout].set(w2)
        bp = jnp.zeros((Cp,), b.dtype).at[:Cout].set(b)
        return jnp.transpose(wp, (1, 0)), bp                    # (Cin, Cp), (Cp,)

    wa_m, ba_p = _prep(wa, ba)
    wc_m, bc_p = _prep(wc, bc)
    w_fused = jnp.concatenate([wa_m, wc_m], axis=1)             # (Cin, 2*Cp)
    b_fused = jnp.concatenate([ba_p, bc_p]).reshape(1, 2 * Cp)  # (1, 2*Cp)

    grid = (B_pad // BB, T // tT)
    kernel = functools.partial(_attention_kernel, cp=Cp)

    out = pl.pallas_call(
        kernel,
        out_shape=jax.ShapeDtypeStruct((B_pad, Cp), jnp.float32),
        grid_spec=pltpu.PrefetchScalarGridSpec(
            num_scalar_prefetch=0,
            grid=grid,
            in_specs=[
                pl.BlockSpec((BB, tT, Cin), lambda b, t: (b, t, 0)),
                pl.BlockSpec((Cin, 2 * Cp), lambda b, t: (0, 0)),
                pl.BlockSpec((1, 2 * Cp), lambda b, t: (0, 0)),
            ],
            out_specs=pl.BlockSpec((BB, Cp), lambda b, t: (b, 0)),
            scratch_shapes=[
                pltpu.VMEM((BB, Cp), jnp.float32),   # num accumulator
                pltpu.VMEM((BB, Cp), jnp.float32),   # den accumulator
            ],
        ),
        compiler_params=pltpu.CompilerParams(
            dimension_semantics=("parallel", "arbitrary")),
    )(x_btc, w_fused, b_fused)

    return out[:B, :Cout]


def init_conv1x1_params(key, n_in, n_out):
    """Matches init_layer: uniform(-scale, scale), scale = sqrt(3)*sqrt(2/n), bias=0."""
    n = n_in * 1 * 1
    std = math.sqrt(2.0 / n)
    scale = std * math.sqrt(3.0)
    w = jax.random.uniform(key, (n_out, n_in, 1, 1), jnp.float32,
                           minval=-scale, maxval=scale)
    b = jnp.zeros((n_out,), jnp.float32)
    return w, b


def reference_forward(x_nchw, wa, ba, wc, bc):
    """Pure-JAX reference mirroring the PyTorch forward."""
    x = jnp.transpose(x_nchw[:, :, :, 0], (0, 2, 1))            # (B, T, Cin)
    att = jax.nn.sigmoid(jnp.einsum('btc,oc->bot', x, wa[:, :, 0, 0]) + ba[None, :, None])
    cla = jax.nn.sigmoid(jnp.einsum('btc,oc->bot', x, wc[:, :, 0, 0]) + bc[None, :, None])
    eps = 1e-07
    att = jnp.clip(att, eps, 1.0 - eps)
    norm_att = att / jnp.sum(att, axis=2, keepdims=True)
    out = jnp.sum(norm_att * cla, axis=2)
    return jnp.clip(out, 0.0, 1.0)


if __name__ == "__main__":
    B, n_in, T, n_out = 2, 4, 16, 8
    key = jax.random.PRNGKey(0)
    kx, ka, kc = jax.random.split(key, 3)

    x = jax.random.normal(kx, (B, n_in, T, 1), jnp.float32)
    wa, ba = init_conv1x1_params(ka, n_in, n_out)
    wc, bc = init_conv1x1_params(kc, n_in, n_out)

    out = attention_forward(x, wa, ba, wc, bc)
    out = jax.block_until_ready(out)

    ref = reference_forward(x, wa, ba, wc, bc)
    assert out.shape == (B, n_out), out.shape
    assert jnp.allclose(out, ref, atol=1e-5, rtol=1e-5), (out, ref)

    print("KERNEL_OK")
</pallas_src>

<mosaic_0001>
module attributes {stable_mosaic.version = 11 : i64} {
  func.func @_attention_kernel(%arg0: i32, %arg1: i32, %arg2: memref<8x16x4xf32, #tpu.memory_space<vmem>>, %arg3: memref<4x256xf32, #tpu.memory_space<vmem>>, %arg4: memref<1x256xf32, #tpu.memory_space<vmem>>, %arg5: memref<8x128xf32, #tpu.memory_space<vmem>>, %arg6: memref<8x128xf32, #tpu.memory_space<vmem>>, %arg7: memref<8x128xf32, #tpu.memory_space<vmem>>) attributes {dimension_semantics = [#tpu.dimension_semantics<parallel>, #tpu.dimension_semantics<arbitrary>], iteration_bounds = array<i64: 1, 1>, scalar_prefetch = 0 : i64, scratch_operands = 2 : i64, tpu.core_type = #tpu.core_type<tc>, window_params = [{transform_indices = @transform_0, window_bounds = array<i64: 8, 16, 4>}, {pipeline_mode = #tpu.pipeline_mode<synchronous>, transform_indices = @transform_1, window_bounds = array<i64: 4, 256>}, {pipeline_mode = #tpu.pipeline_mode<synchronous>, transform_indices = @transform_2, window_bounds = array<i64: 1, 256>}, {transform_indices = @transform_3, window_bounds = array<i64: 8, 128>}]} {
    %c0_i32 = arith.constant 0 : i32
    %0 = arith.cmpi eq, %arg1, %c0_i32 : i32
    %1 = arith.extui %0 : i1 to i32
    %c0_i32_0 = arith.constant 0 : i32
    %2 = arith.cmpi ne, %1, %c0_i32_0 : i32
    scf.if %2 {
      %cst_22 = arith.constant 0.000000e+00 : f32
      %35 = vector.broadcast %cst_22 : f32 to vector<8x128xf32>
      %c0_23 = arith.constant 0 : index
      %c0_24 = arith.constant 0 : index
      %36 = vector.load %arg6[%c0_23, %c0_24] : memref<8x128xf32, #tpu.memory_space<vmem>>, vector<8x128xf32>
      tpu.vector_store %arg6[%c0_23, %c0_24], %35 {strides = array<i32>} : memref<8x128xf32, #tpu.memory_space<vmem>>, vector<8x128xf32>,
      %cst_25 = arith.constant 0.000000e+00 : f32
      %37 = vector.broadcast %cst_25 : f32 to vector<8x128xf32>
      %c0_26 = arith.constant 0 : index
      %c0_27 = arith.constant 0 : index
      %38 = vector.load %arg7[%c0_26, %c0_27] : memref<8x128xf32, #tpu.memory_space<vmem>>, vector<8x128xf32>
      tpu.vector_store %arg7[%c0_26, %c0_27], %37 {strides = array<i32>} : memref<8x128xf32, #tpu.memory_space<vmem>>, vector<8x128xf32>,
    } else {
    }
    %c0 = arith.constant 0 : index
    %c0_1 = arith.constant 0 : index
    %c0_2 = arith.constant 0 : index
    %3 = vector.load %arg2[%c0, %c0_1, %c0_2] : memref<8x16x4xf32, #tpu.memory_space<vmem>>, vector<8x16x4xf32>
    %4 = vector.shape_cast %3 : vector<8x16x4xf32> to vector<128x4xf32>
    %c0_3 = arith.constant 0 : index
    %c0_4 = arith.constant 0 : index
    %5 = vector.load %arg3[%c0_3, %c0_4] : memref<4x256xf32, #tpu.memory_space<vmem>>, vector<4x256xf32>
    %cst = arith.constant dense<0.000000e+00> : vector<128x256xf32>
    %6 = tpu.matmul %4, %5, %cst {dimension_numbers = #tpu.dot_dimension_numbers<[1], [0], [0], [1], [0, 0, 1, 1], [], []>} : vector<128x4xf32>, vector<4x256xf32>, vector<128x256xf32> -> vector<128x256xf32>
    %c0_5 = arith.constant 0 : index
    %c0_6 = arith.constant 0 : index
    %7 = vector.load %arg4[%c0_5, %c0_6] : memref<1x256xf32, #tpu.memory_space<vmem>>, vector<1x256xf32>
    %8 = vector.broadcast %7 : vector<1x256xf32> to vector<128x256xf32>
    %9 = arith.addf %6, %8 : vector<128x256xf32>
    %10 = arith.negf %9 : vector<128x256xf32>
    %11 = math.exp %10 : vector<128x256xf32>
    %cst_7 = arith.constant 1.000000e+00 : f32
    %12 = vector.broadcast %cst_7 : f32 to vector<128x256xf32>
    %13 = arith.addf %12, %11 : vector<128x256xf32>
    %14 = arith.divf %12, %13 : vector<128x256xf32>
    %15 = vector.extract_strided_slice %14 {offsets = [0, 0], sizes = [128, 128], strides = [1, 1]} : vector<128x256xf32> to vector<128x128xf32>
    %cst_8 = arith.constant 1.000000e-07 : f32
    %cst_9 = arith.constant 0.99999988 : f32
    %16 = vector.broadcast %cst_8 : f32 to vector<128x128xf32>
    %17 = arith.maximumf %16, %15 : vector<128x128xf32>
    %18 = vector.broadcast %cst_9 : f32 to vector<128x128xf32>
    %19 = arith.minimumf %18, %17 : vector<128x128xf32>
    %20 = vector.extract_strided_slice %14 {offsets = [0, 128], sizes = [128, 128], strides = [1, 1]} : vector<128x256xf32> to vector<128x128xf32>
    %c0_10 = arith.constant 0 : index
    %c0_11 = arith.constant 0 : index
    %21 = vector.load %arg7[%c0_10, %c0_11] : memref<8x128xf32, #tpu.memory_space<vmem>>, vector<8x128xf32>
    %22 = vector.shape_cast %19 : vector<128x128xf32> to vector<8x16x128xf32>
    %cst_12 = arith.constant dense<0.000000e+00> : vector<8x128xf32>
    %23 = vector.multi_reduction <add>, %22, %cst_12 [1] : vector<8x16x128xf32> to vector<8x128xf32>
    %24 = arith.addf %21, %23 : vector<8x128xf32>
    %c0_13 = arith.constant 0 : index
    %c0_14 = arith.constant 0 : index
    %25 = vector.load %arg7[%c0_13, %c0_14] : memref<8x128xf32, #tpu.memory_space<vmem>>, vector<8x128xf32>
    tpu.vector_store %arg7[%c0_13, %c0_14], %24 {strides = array<i32>} : memref<8x128xf32, #tpu.memory_space<vmem>>, vector<8x128xf32>,
    %c0_15 = arith.constant 0 : index
    %c0_16 = arith.constant 0 : index
    %26 = vector.load %arg6[%c0_15, %c0_16] : memref<8x128xf32, #tpu.memory_space<vmem>>, vector<8x128xf32>
    %27 = arith.mulf %19, %20 : vector<128x128xf32>
    %28 = vector.shape_cast %27 : vector<128x128xf32> to vector<8x16x128xf32>
    %cst_17 = arith.constant dense<0.000000e+00> : vector<8x128xf32>
    %29 = vector.multi_reduction <add>, %28, %cst_17 [1] : vector<8x16x128xf32> to vector<8x128xf32>
    %30 = arith.addf %26, %29 : vector<8x128xf32>
    %c0_18 = arith.constant 0 : index
    %c0_19 = arith.constant 0 : index
    %31 = vector.load %arg6[%c0_18, %c0_19] : memref<8x128xf32, #tpu.memory_space<vmem>>, vector<8x128xf32>
    tpu.vector_store %arg6[%c0_18, %c0_19], %30 {strides = array<i32>} : memref<8x128xf32, #tpu.memory_space<vmem>>, vector<8x128xf32>,
    %c0_i32_20 = arith.constant 0 : i32
    %32 = arith.cmpi eq, %arg1, %c0_i32_20 : i32
    %33 = arith.extui %32 : i1 to i32
    %c0_i32_21 = arith.constant 0 : i32
    %34 = arith.cmpi ne, %33, %c0_i32_21 : i32
    scf.if %34 {
      %c0_22 = arith.constant 0 : index
      %c0_23 = arith.constant 0 : index
      %35 = vector.load %arg6[%c0_22, %c0_23] : memref<8x128xf32, #tpu.memory_space<vmem>>, vector<8x128xf32>
      %c0_24 = arith.constant 0 : index
      %c0_25 = arith.constant 0 : index
      %36 = vector.load %arg7[%c0_24, %c0_25] : memref<8x128xf32, #tpu.memory_space<vmem>>, vector<8x128xf32>
      %37 = arith.divf %35, %36 : vector<8x128xf32>
      %cst_26 = arith.constant 0.000000e+00 : f32
      %cst_27 = arith.constant 1.000000e+00 : f32
      %38 = vector.broadcast %cst_26 : f32 to vector<8x128xf32>
      %39 = arith.maximumf %38, %37 : vector<8x128xf32>
      %40 = vector.broadcast %cst_27 : f32 to vector<8x128xf32>
      %41 = arith.minimumf %40, %39 : vector<8x128xf32>
      %c0_28 = arith.constant 0 : index
      %c0_29 = arith.constant 0 : index
      %42 = vector.load %arg5[%c0_28, %c0_29] : memref<8x128xf32, #tpu.memory_space<vmem>>, vector<8x128xf32>
      tpu.vector_store %arg5[%c0_28, %c0_29], %41 {strides = array<i32>} : memref<8x128xf32, #tpu.memory_space<vmem>>, vector<8x128xf32>,
    } else {
    }
    return
  }
  func.func @transform_0(%arg0: i32, %arg1: i32) -> (i32, i32, i32) {
    %c0_i32 = arith.constant 0 : i32
    %c0_i32_0 = arith.constant 0 : i32
    return %arg0, %arg1, %c0_i32 : i32, i32, i32
  }
  func.func @transform_1(%arg0: i32, %arg1: i32) -> (i32, i32) {
    %c0_i32 = arith.constant 0 : i32
    %c0_i32_0 = arith.constant 0 : i32
    %c0_i32_1 = arith.constant 0 : i32
    return %c0_i32, %c0_i32_0 : i32, i32
  }
  func.func @transform_2(%arg0: i32, %arg1: i32) -> (i32, i32) {
    %c0_i32 = arith.constant 0 : i32
    %c0_i32_0 = arith.constant 0 : i32
    %c0_i32_1 = arith.constant 0 : i32
    return %c0_i32, %c0_i32_0 : i32, i32
  }
  func.func @transform_3(%arg0: i32, %arg1: i32) -> (i32, i32) {
    %c0_i32 = arith.constant 0 : i32
    %c0_i32_0 = arith.constant 0 : i32
    return %arg0, %c0_i32 : i32, i32
  }
}

</mosaic_0001>

<bundles_post_ra>
// kernel: tpu_custom_call.1
= control target key start
LH: loop header
LB: loop body
LE: loop exit
PB: predicated region body
PF: predicated region fallthrough
CT: control target
= control target key end

     0   :  { %s2348_s0 = inlined_call_operand.vmem [shape: f32[8,16,4], index: 0, kind: input, shape index: {}]   ;;  %s2349_s1 = inlined_call_operand.vmem [shape: f32[4,256], index: 1, kind: input, shape index: {}]   ;;  %s2350_s2 = inlined_call_operand.vmem [shape: f32[1,256], index: 2, kind: input, shape index: {}]   ;;  %s2351_s3 = inlined_call_operand.hbm [shape: f32[8,128], index: 3, kind: output, shape index: {}]  }
   0x1   :  { %v37_v0 = vld [vmem:[%s2349_s1] sm:$0xff] }
   0x2   :  { %45 = vst [vmem:[#allocation1] ss:$2 sm:$0xff] %v37_v0 }
   0x3   :  { %8 = vsyncpa [#allocation5], 0  ;;  %vm97_vm0 = vcmask 1043456   ;;  %v21_v1 = vld [vmem:[%s2348_s0] sm:$0xff]  ;;  %vm48_vm1 = vcmask 31744   ;;  %v22_v5 = vld [vmem:[%s2348_s0 + $0x8] sm:$0xff] }
   0x4   :  { %v29_v2 = vld [vmem:[%s2348_s0 + $0x40] sm:$0xff]  ;;  %v30_v6 = vld [vmem:[%s2348_s0 + $0x48] sm:$0xff]  ;;  %v23_v7 = vld [vmem:[%s2348_s0 + $0x10] sm:$0xff]  ;;  %s1075_s21 = sshll.u32 %s2351_s3, 4  ;;  %s1076_s21 = int_to_ptr.hbm [resolvable:$true] %s1075_s21 }
   0x5   :  { %v31_v8 = vld [vmem:[%s2348_s0 + $0x50] sm:$0xff]  ;;  %v24_v9 = vld [vmem:[%s2348_s0 + $0x18] sm:$0xff]  ;;  %v25_v11 = vld [vmem:[%s2348_s0 + $0x20] sm:$0xff] }
   0x6   :  { %v32_v10 = vld [vmem:[%s2348_s0 + $0x58] sm:$0xff]  ;;  %v33_v12 = vld [vmem:[%s2348_s0 + $0x60] sm:$0xff]  ;;  %v26_v13 = vld [vmem:[%s2348_s0 + $0x28] sm:$0xff] }
   0x7   :  { %v34_v14 = vld [vmem:[%s2348_s0 + $0x68] sm:$0xff]  ;;  %v27_v15 = vld [vmem:[%s2348_s0 + $0x30] sm:$0xff]  ;;  %v28_v17 = vld [vmem:[%s2348_s0 + $0x38] sm:$0xff] }
   0x8   :  { %v35_v16 = vld [vmem:[%s2348_s0 + $0x70] sm:$0xff]  ;;  %v36_v18 = vld [vmem:[%s2348_s0 + $0x78] sm:$0xff]  ;;  %v38_v19 = vld [vmem:[%s2350_s2] sm:$0x3]  ;;  %s1309_s0 = smov [#allocation4]  }
   0x9   :  { %v46_v3 = vld.sshfl [vmem:[#allocation1] sm:$0xff pattern:$0x75316420]  ;;  %v47_v4 = vld.sshfl [vmem:[#allocation1 + $0x8] sm:$0xff pattern:$0x75316420] }
   0xa   :  { %1084 = vmatpush.msk.msra.mxu0 %vm97_vm0, %v46_v3  ;;  %1150 = vmatpush.msk.msra.mxu2 %vm97_vm0, %v46_v3  ;;  %v1416_v20 = vperm.slane %v38_v19, 0  ;;  %v1418_v21 = vperm.slane %v38_v19, 1  ;;  %s1073_s2 = sshll.u32 %s1309_s0, 4  ;;  %s1074_s2 = int_to_ptr.vmem [resolvable:$true] %s1073_s2 }
   0xb   :  { %1085 = vmatmul.msk.f32.vlgmr.msra.gmra.mxu0 %vm48_vm1, %v21_v1  ;;  %1093 = vmatmul.msk.f32.vlgmr.msra.gmra.mxu2 %vm48_vm1, %v29_v2 }
   0xc   :  { %1101 = vmatpush.msk.msra.mxu1 %vm97_vm0, %v47_v4  ;;  %1151 = vmatpush.msk.msra.mxu3 %vm97_vm0, %v47_v4 }
   0xd   :  { %1102 = vmatmul.msk.f32.vlgmr.msra.gmra.mxu1 %vm48_vm1, %v21_v1  ;;  %1110 = vmatmul.msk.f32.vlgmr.msra.gmra.mxu3 %vm48_vm1, %v29_v2 }
  0x13   :  { %1086 = vmatmul.msk.f32.gmra.mxu0 %vm48_vm1, %v22_v5  ;;  %1094 = vmatmul.msk.f32.gmra.mxu2 %vm48_vm1, %v30_v6 }
  0x15   :  { %1103 = vmatmul.msk.f32.gmra.mxu1 %vm48_vm1, %v22_v5  ;;  %1111 = vmatmul.msk.f32.gmra.mxu3 %vm48_vm1, %v30_v6 }
  0x1b   :  { %1087 = vmatmul.msk.f32.gmra.mxu0 %vm48_vm1, %v23_v7  ;;  %1095 = vmatmul.msk.f32.gmra.mxu2 %vm48_vm1, %v31_v8 }
  0x1d   :  { %1104 = vmatmul.msk.f32.gmra.mxu1 %vm48_vm1, %v23_v7  ;;  %1112 = vmatmul.msk.f32.gmra.mxu3 %vm48_vm1, %v31_v8 }
  0x23   :  { %1088 = vmatmul.msk.f32.gmra.mxu0 %vm48_vm1, %v24_v9  ;;  %1096 = vmatmul.msk.f32.gmra.mxu2 %vm48_vm1, %v32_v10 }
  0x25   :  { %1105 = vmatmul.msk.f32.gmra.mxu1 %vm48_vm1, %v24_v9  ;;  %1113 = vmatmul.msk.f32.gmra.mxu3 %vm48_vm1, %v32_v10 }
  0x2b   :  { %1089 = vmatmul.msk.f32.gmra.mxu0 %vm48_vm1, %v25_v11  ;;  %1097 = vmatmul.msk.f32.gmra.mxu2 %vm48_vm1, %v33_v12 }
  0x2d   :  { %1106 = vmatmul.msk.f32.gmra.mxu1 %vm48_vm1, %v25_v11  ;;  %1114 = vmatmul.msk.f32.gmra.mxu3 %vm48_vm1, %v33_v12 }
  0x33   :  { %1090 = vmatmul.msk.f32.gmra.mxu0 %vm48_vm1, %v26_v13  ;;  %1098 = vmatmul.msk.f32.gmra.mxu2 %vm48_vm1, %v34_v14 }
  0x35   :  { %1107 = vmatmul.msk.f32.gmra.mxu1 %vm48_vm1, %v26_v13  ;;  %1115 = vmatmul.msk.f32.gmra.mxu3 %vm48_vm1, %v34_v14 }
  0x3b   :  { %1091 = vmatmul.msk.f32.gmra.mxu0 %vm48_vm1, %v27_v15  ;;  %1099 = vmatmul.msk.f32.gmra.mxu2 %vm48_vm1, %v35_v16 }
  0x3d   :  { %1108 = vmatmul.msk.f32.gmra.mxu1 %vm48_vm1, %v27_v15  ;;  %1116 = vmatmul.msk.f32.gmra.mxu3 %vm48_vm1, %v35_v16 }
  0x43   :  { %1092 = vmatmul.msk.f32.gmra.mxu0 %vm48_vm1, %v28_v17  ;;  %1100 = vmatmul.msk.f32.gmra.mxu2 %vm48_vm1, %v36_v18 }
  0x45   :  { %1109 = vmatmul.msk.f32.gmra.mxu1 %vm48_vm1, %v28_v17  ;;  %1117 = vmatmul.msk.f32.gmra.mxu3 %vm48_vm1, %v36_v18 }
  0x88   :  { %v119_v22 = vpop.f32.mrf.mxu0 }
  0x89   :  { %v120_v23 = vadd.f32 %v119_v22, %v1416_v20 }
  0x8a   :  { %v184_v24 = vpop.f32.mrf.mxu1 }
  0x8b   :  { %v1118_v25 = vmul.f32 -1.442695, %v120_v23  ;;  %v185_v26 = vadd.f32 %v184_v24, %v1418_v21 }
  0x8d   :  { %1153 = vpow2.f32 %v1118_v25  ;;  %v1119_v27 = vmul.f32 -1.442695, %v185_v26 }
  0x8e   :  { %v143_v28 = vpop.f32.mrf.mxu2 }
  0x8f   :  { %v144_v29 = vadd.f32 %v143_v28, %v1416_v20  ;;  %1155 = vpow2.f32 %v1119_v27 }
  0x90   :  { %v122_v30 = vpop.f32.mrf.mxu0  ;;  %v208_v33 = vpop.f32.mrf.mxu3 }
  0x91   :  { %v1134_v31 = vmul.f32 -1.442695, %v144_v29  ;;  %v123_v32 = vadd.f32 %v122_v30, %v1416_v20  ;;  %v209_v39 = vadd.f32 %v208_v33, %v1418_v21 }
  0x92   :  { %v187_v34 = vpop.f32.mrf.mxu1 }
  0x93   :  { %v1154_v35 = vpop.eup %1153  ;;  %1157 = vpow2.f32 %v1134_v31  ;;  %v1120_v36 = vmul.f32 -1.442695, %v123_v32  ;;  %v188_v37 = vadd.f32 %v187_v34, %v1418_v21  ;;  %v1135_v43 = vmul.f32 -1.442695, %v209_v39 }
  0x94   :  { %v1425_v38 = vadd.f32 1.0, %v1154_v35 }
  0x95   :  { %1159 = vpow2.f32 %v1120_v36  ;;  %v1121_v40 = vmul.f32 -1.442695, %v188_v37  ;;  %v1156_v42 = vpop.eup %1155 }
  0x96   :  { %1161 = vrcp.f32 %v1425_v38  ;;  %v146_v41 = vpop.f32.mrf.mxu2  ;;  %v1430_v46 = vadd.f32 1.0, %v1156_v42  ;;  %vm365_vm2 = vweird.f32 %v1425_v38  ;;  %v369_v4 = vand.u32 2147483647, %v1425_v38 }
  0x97   :  { %1163 = vpow2.f32 %v1121_v40  ;;  %v147_v45 = vadd.f32 %v146_v41, %v1416_v20  ;;  %v371_v14 = vand.u32 2147483648, %v1425_v38 }
  0x98   :  { %1165 = vpow2.f32 %v1135_v43  ;;  %v125_v54 = vpop.f32.mrf.mxu0  ;;  %v211_v13 = vpop.f32.mrf.mxu3  ;;  %v386_v18 = vand.u32 2147483648, %v1430_v46  ;;  %v384_v22 = vand.u32 2147483647, %v1430_v46  ;;  %vm370_vm9 = vcmp.eq.f32.partialorder %v369_v4, 8.507059e+37 }
  0x99   :  { %v1158_v44 = vpop.eup %1157  ;;  %v1136_v52 = vmul.f32 -1.442695, %v147_v45  ;;  %1167 = vrcp.f32 %v1430_v46  ;;  %v126_v58 = vadd.f32 %v125_v54, %v1416_v20  ;;  %v212_v24 = vadd.f32 %v211_v13, %v1418_v21 }
  0x9a   :  { %v1434_v49 = vadd.f32 1.0, %v1158_v44  ;;  %v190_v25 = vpop.f32.mrf.mxu1  ;;  %v372_v31 = vor.u32 1.1754944e-38, %v371_v14  ;;  %vm380_vm10 = vweird.f32 %v1430_v46  ;;  %v387_v35 = vor.u32 1.1754944e-38, %v386_v18 }
  0x9b   :  { %v1160_v47 = vpop.eup %1159  ;;  %v1122_v3 = vmul.f32 -1.442695, %v126_v58  ;;  %v191_v36 = vadd.f32 %v190_v25, %v1418_v21  ;;  %vm1489_vm13 = vcmp.eq.f32.partialorder %v384_v22, 8.507059e+37  ;;  %v1137_v40 = vmul.f32 -1.442695, %v212_v24 }
  0x9c   :  { %v1432_v48 = vpop.eup %1161  ;;  %v330_v51 = vadd.f32 1.0, %v1160_v47  ;;  %vm605_vm11 = vweird.f32 %v1434_v49  ;;  %v609_v4 = vand.u32 2147483647, %v1434_v49 }
  0x9d   :  { %v361_v50 = vmul.f32 %v1432_v48, %v1425_v38  ;;  %v1164_v53 = vpop.eup %1163  ;;  %vm366_vm3 = vweird.f32 %v1432_v48  ;;  %v1123_v58 = vmul.f32 -1.442695, %v191_v36 }
  0x9e   :  { %1169 = vrcp.f32 %v330_v51  ;;  %v1166_v56 = vpop.eup %1165  ;;  %v1440_v57 = vadd.f32 1.0, %v1164_v53  ;;  %v399_v7 = vand.u32 2147483647, %v330_v51  ;;  %v401_v8 = vand.u32 2147483648, %v330_v51  ;;  %vm1471_vm5 = vmor %vm365_vm2, %vm366_vm3  ;;  %v149_v34 = vpop.f32.mrf.mxu2 }
  0x9f   :  { %1171 = vrcp.f32 %v1434_v49  ;;  %v362_v55 = vsub.f32 1.0, %v361_v50  ;;  %v1443_v59 = vpop.eup %1167  ;;  %v1447_v62 = vadd.f32 1.0, %v1166_v56  ;;  %vm395_vm6 = vweird.f32 %v330_v51 }
  0xa0   :  { %1173 = vpow2.f32 %v1136_v52  ;;  %v376_v2 = vmul.f32 %v1443_v59, %v1430_v46  ;;  %vm400_vm8 = vcmp.eq.f32.partialorder %v399_v7, 8.507059e+37  ;;  %v402_v23 = vor.u32 1.1754944e-38, %v401_v8  ;;  %v128_v47 = vpop.f32.mrf.mxu0 }
  0xa1   :  { %1175 = vrcp.f32 %v1440_v57  ;;  %v363_v61 = vmul.f32 %v1432_v48, %v362_v55  ;;  %vm381_vm12 = vweird.f32 %v1443_v59  ;;  %v150_v45 = vadd.f32 %v149_v34, %v1416_v20 }
  0xa2   :  { %1177 = vrcp.f32 %v1447_v62  ;;  %v377_v15 = vsub.f32 1.0, %v376_v2  ;;  %vm410_vm15 = vweird.f32 %v1440_v57  ;;  %v414_v50 = vand.u32 2147483647, %v1440_v57  ;;  %vm1507_vm0 = vmor %vm380_vm10, %vm381_vm12  ;;  %v214_v2 = vpop.f32.mrf.mxu3 }
  0xa3   :  { %v364_v6 = vadd.f32 %v1432_v48, %v363_v61  ;;  %1179 = vpow2.f32 %v1122_v3  ;;  %v215_v14 = vadd.f32 %v214_v2, %v1418_v21 }
  0xa4   :  { %v1170_v60 = vpop.eup %1169  ;;  %v378_v32 = vmul.f32 %v1443_v59, %v377_v15  ;;  %vm1532_vm3 = vcmp.eq.f32.partialorder %v414_v50, 8.507059e+37 }
  0xa5   :  { %v1449_v63 = vpop.eup %1171  ;;  %v391_v0 = vmul.f32 %v1170_v60, %v330_v51  ;;  %vm396_vm4 = vweird.f32 %v1170_v60  ;;  %v368_v26 = vsel %vm1471_vm5, %v1432_v48, %v364_v6  ;;  %v416_v51 = vand.u32 2147483648, %v1440_v57 }
  0xa6   :  { %v1174_v1 = vpop.eup %1173  ;;  %v601_v10 = vmul.f32 %v1449_v63, %v1434_v49  ;;  %vm397_vm7 = vmor %vm395_vm6, %vm396_vm4  ;;  %v373_v38 = vsel %vm370_vm9, %v372_v31, %v368_v26  ;;  %vm606_vm14 = vweird.f32 %v1449_v63  ;;  %v379_v48 = vadd.f32 %v1443_v59, %v378_v32 }
  0xa7   :  { %v392_v5 = vsub.f32 1.0, %v391_v0  ;;  %v1458_v9 = vpop.eup %1175  ;;  %v1462_v12 = vadd.f32 1.0, %v1174_v1  ;;  %v840_v52 = vmax.f32 %v373_v38, 1e-07  ;;  %v1138_v1 = vmul.f32 -1.442695, %v150_v45  ;;  %vm1541_vm4 = vmor %vm605_vm11, %vm606_vm14 }
  0xa8   :  { %v406_v16 = vmul.f32 %v1458_v9, %v1440_v57  ;;  %v602_v27 = vsub.f32 1.0, %v601_v10  ;;  %v1482_v30 = vpop.eup %1177  ;;  %vm411_vm1 = vweird.f32 %v1458_v9  ;;  %v383_v3 = vsel %vm1507_vm0, %v1443_v59, %v379_v48  ;;  %v131_v2 = vpop.f32.mrf.mxu0 }
  0xa9   :  { %v393_v11 = vmul.f32 %v1170_v60, %v392_v5  ;;  %1181 = vrcp.f32 %v1462_v12  ;;  %v1180_v37 = vpop.eup %1179  ;;  %v616_v54 = vmul.f32 %v1482_v30, %v1447_v62  ;;  %v611_v5 = vand.u32 2147483648, %v1434_v49  ;;  %vm1528_vm2 = vmor %vm410_vm15, %vm411_vm1 }
  0xaa   :  { %v407_v29 = vsub.f32 1.0, %v406_v16  ;;  %v603_v42 = vmul.f32 %v1449_v63, %v602_v27  ;;  %v1514_v55 = vadd.f32 1.0, %v1180_v37  ;;  %1183 = vpow2.f32 %v1137_v40 }
  0xab   :  { %v394_v19 = vadd.f32 %v1170_v60, %v393_v11  ;;  %v856_v8 = vmin.f32 %v840_v52, 0.9999999  ;;  %v617_v10 = vsub.f32 1.0, %v616_v54  ;;  %v417_v11 = vor.u32 1.1754944e-38, %v416_v51 }
  0xac   :  { %v408_v44 = vmul.f32 %v1458_v9, %v407_v29  ;;  %v604_v46 = vadd.f32 %v1449_v63, %v603_v42  ;;  %1185 = vrcp.f32 %v1514_v55  ;;  %v612_v18 = vor.u32 1.1754944e-38, %v611_v5 }
  0xad   :  { %v398_v28 = vsel %vm397_vm7, %v1170_v60, %v394_v19  ;;  %v129_v60 = vadd.f32 %v128_v47, %v1416_v20  ;;  %1187 = vpow2.f32 %v1123_v58  ;;  %v388_v19 = vsel %vm1489_vm13, %v387_v35, %v383_v3 }
  0xae   :  { %v403_v33 = vsel %vm400_vm8, %v402_v23, %v398_v28  ;;  %v409_v0 = vadd.f32 %v1458_v9, %v408_v44  ;;  %v608_v15 = vsel %vm1541_vm4, %v1449_v63, %v604_v46  ;;  %1189 = vpow2.f32 %v1138_v1  ;;  %v193_v44 = vpop.f32.mrf.mxu1  ;;  %v152_v46 = vpop.f32.mrf.mxu2 }
  0xaf   :  { %v1494_v41 = vpop.eup %1181  ;;  %v841_v43 = vmax.f32 %v403_v33, 1e-07  ;;  %v1124_v13 = vmul.f32 -1.442695, %v129_v60  ;;  %vm610_vm5 = vcmp.eq.f32.partialorder %v609_v4, 8.507059e+37  ;;  %v618_v22 = vmul.f32 %v1482_v30, %v617_v10 }
  0xb0   :  { %v631_v56 = vmul.f32 %v1494_v41, %v1462_v12  ;;  %v413_v17 = vsel %vm1528_vm2, %v1458_v9, %v409_v0  ;;  %v1184_v49 = vpop.eup %1183  ;;  %v613_v23 = vsel %vm610_vm5, %v612_v18, %v608_v15  ;;  %v1139_v25 = vmul.f32 -1.442695, %v215_v14 }
  0xb1   :  { %v857_v61 = vmin.f32 %v841_v43, 0.9999999  ;;  %1191 = vpow2.f32 %v1124_v13  ;;  %v418_v24 = vsel %vm1532_vm3, %v417_v11, %v413_v17  ;;  %vm620_vm6 = vweird.f32 %v1447_v62 }
  0xb2   :  { %v632_v57 = vsub.f32 1.0, %v631_v56  ;;  %v1558_v26 = vpop.eup %1185  ;;  %vm621_vm7 = vweird.f32 %v1482_v30  ;;  %v1562_v27 = vadd.f32 1.0, %v1184_v49  ;;  %v624_v29 = vand.u32 2147483647, %v1447_v62 }
  0xb3   :  { %v873_v16 = vadd.f32 %v857_v61, %v856_v8  ;;  %v1188_v28 = vpop.eup %1187  ;;  %v626_v31 = vand.u32 2147483648, %v1447_v62  ;;  %v955_v33 = vmul.f32 %v856_v8, %v388_v19  ;;  %v848_v34 = vmax.f32 %v613_v23, 1e-07  ;;  %vm1567_vm8 = vmor %vm620_vm6, %vm621_vm7 }
  0xb4   :  { %v633_v63 = vmul.f32 %v1494_v41, %v632_v57  ;;  %v1190_v32 = vpop.eup %1189  ;;  %v619_v35 = vadd.f32 %v1482_v30, %v618_v22  ;;  %v956_v36 = vmul.f32 %v857_v61, %v418_v24  ;;  %vm636_vm9 = vweird.f32 %v1494_v41 }
  0xb5   :  { %v874_v9 = vrot.slane %v873_v16, 4  ;;  %v421_v40 = vmul.f32 %v1558_v26, %v1514_v55  ;;  %1193 = vpow2.f32 %v1139_v25  ;;  %v641_v42 = vand.u32 2147483648, %v1462_v12 }
  0xb6   :  { %v634_v39 = vadd.f32 %v1494_v41, %v633_v63  ;;  %1195 = vrcp.f32 %v1562_v27  ;;  %v627_v45 = vor.u32 1.1754944e-38, %v626_v31  ;;  %vm635_vm10 = vweird.f32 %v1462_v12 }
  0xb7   :  { %v1192_v37 = vpop.eup %1191  ;;  %v875_v62 = vadd.f32 %v874_v9, %v873_v16  ;;  %v639_v47 = vand.u32 2147483647, %v1462_v12  ;;  %v1581_v48 = vadd.f32 1.0, %v1188_v28  ;;  %v623_v50 = vsel %vm1567_vm8, %v1482_v30, %v619_v35  ;;  %vm1588_vm12 = vmor %vm635_vm10, %vm636_vm9  ;;  %v196_v35 = vpop.f32.mrf.mxu1 }
  0xb8   :  { %v1577_v43 = vadd.f32 1.0, %v1192_v37  ;;  %vm625_vm11 = vcmp.eq.f32.partialorder %v624_v29, 8.507059e+37  ;;  %v971_v51 = vadd.f32 %v956_v36, %v955_v33  ;;  %v1592_v53 = vadd.f32 1.0, %v1190_v32  ;;  %v217_v32 = vpop.f32.mrf.mxu3 }
  0xb9   :  { %v638_v12 = vsel %vm1588_vm12, %v1494_v41, %v634_v39  ;;  %v422_v54 = vsub.f32 1.0, %v421_v40  ;;  %v194_v56 = vadd.f32 %v193_v44, %v1418_v21  ;;  %v1599_v30 = vmin.f32 %v848_v34, 0.9999999 }
  0xba   :  { %1197 = vrcp.f32 %v1577_v43  ;;  %v876_v58 = vrot.slane %v875_v62, 2  ;;  %v642_v60 = vor.u32 1.1754944e-38, %v641_v42  ;;  %v628_v0 = vsel %vm625_vm11, %v627_v45, %v623_v50 }
  0xbb   :  { %v1194_v61 = vpop.eup %1193  ;;  %vm640_vm13 = vcmp.eq.f32.partialorder %v639_v47, 8.507059e+37  ;;  %v431_v1 = vand.u32 2147483648, %v1514_v55  ;;  %1199 = vrcp.f32 %v1581_v48  ;;  %v972_v41 = vrot.slane %v971_v51, 4 }
  0xbc   :  { %v1603_v3 = vpop.eup %1195  ;;  %v643_v4 = vsel %vm640_vm13, %v642_v60, %v638_v12  ;;  %v429_v5 = vand.u32 2147483647, %v1514_v55  ;;  %1201 = vrcp.f32 %v1592_v53  ;;  %v423_v6 = vmul.f32 %v1558_v26, %v422_v54  ;;  %v155_v12 = vpop.f32.mrf.mxu2 }
  0xbd   :  { %v656_v7 = vand.u32 2147483648, %v1562_v27  ;;  %v1125_v8 = vmul.f32 -1.442695, %v194_v56  ;;  %v153_v10 = vadd.f32 %v152_v46, %v1416_v20  ;;  %v877_v11 = vadd.f32 %v876_v58, %v875_v62 }
  0xbe   :  { %v1611_v59 = vmul.f32 %v1599_v30, %v628_v0  ;;  %v1613_v57 = vadd.f32 1.0, %v1194_v61  ;;  %v132_v13 = vadd.f32 %v131_v2, %v1416_v20  ;;  %v849_v15 = vmax.f32 %v643_v4, 1e-07 }
  0xbf   :  { %vm425_vm14 = vweird.f32 %v1514_v55  ;;  %v432_v16 = vor.u32 1.1754944e-38, %v431_v1  ;;  %v646_v17 = vmul.f32 %v1603_v3, %v1562_v27  ;;  %v1621_v49 = vadd.f32 %v972_v41, %v971_v51 }
  0xc0   :  { %v1616_v14 = vpop.eup %1197  ;;  %vm426_vm15 = vweird.f32 %v1558_v26  ;;  %vm1624_vm0 = vcmp.eq.f32.partialorder %v429_v5, 8.507059e+37  ;;  %v654_v19 = vand.u32 2147483647, %v1562_v27  ;;  %v424_v24 = vadd.f32 %v1558_v26, %v423_v6 }
  0xc1   :  { %v451_v22 = vmul.f32 %v1616_v14, %v1577_v43  ;;  %v1631_v23 = vpop.eup %1199  ;;  %v1634_v63 = vor.u32 1.1754944e-38, %v656_v7  ;;  %1203 = vpow2.f32 %v1125_v8  ;;  %v1140_v25 = vmul.f32 -1.442695, %v153_v10  ;;  %vm1647_vm3 = vmor %vm425_vm14, %vm426_vm15 }
  0xc2   :  { %v1636_v9 = vpop.eup %1201  ;;  %v878_v28 = vrot.slane %v877_v11, 1  ;;  %vm650_vm1 = vweird.f32 %v1562_v27  ;;  %1205 = vrcp.f32 %v1613_v57  ;;  %v1126_v31 = vmul.f32 -1.442695, %v132_v13 }
  0xc3   :  { %v452_v29 = vsub.f32 1.0, %v451_v22  ;;  %v1640_v33 = vmin.f32 %v849_v15, 0.9999999  ;;  %v647_v34 = vsub.f32 1.0, %v646_v17  ;;  %vm651_vm2 = vweird.f32 %v1603_v3 }
  0xc4   :  { %1207 = vpow2.f32 %v1140_v25  ;;  %v436_v37 = vmul.f32 %v1631_v23, %v1581_v48  ;;  %vm456_vm4 = vweird.f32 %v1616_v14  ;;  %v428_v39 = vsel %vm1647_vm3, %v1558_v26, %v424_v24  ;;  %vm1705_vm10 = vmor %vm650_vm1, %vm651_vm2 }
  0xc5   :  { %v453_v38 = vmul.f32 %v1616_v14, %v452_v29  ;;  %1209 = vpow2.f32 %v1126_v31  ;;  %v661_v40 = vmul.f32 %v1636_v9, %v1592_v53  ;;  %v461_v55 = vand.u32 2147483648, %v1577_v43 }
  0xc6   :  { %v218_v62 = vadd.f32 %v217_v32, %v1418_v21  ;;  %vm455_vm5 = vweird.f32 %v1577_v43  ;;  %v459_v44 = vand.u32 2147483647, %v1577_v43  ;;  %v197_v45 = vadd.f32 %v196_v35, %v1418_v21 }
  0xc7   :  { %v454_v42 = vadd.f32 %v1616_v14, %v453_v38  ;;  %v1204_v47 = vpop.eup %1203  ;;  %v1666_v50 = vadd.f32 %v878_v28, %v877_v11  ;;  %v901_v26 = vadd.f32 %v1640_v33, %v1599_v30  ;;  %v648_v51 = vmul.f32 %v1603_v3, %v647_v34  ;;  %vm1674_vm7 = vmor %vm455_vm5, %vm456_vm4 }
  0xc8   :  { %vm440_vm6 = vweird.f32 %v1581_v48  ;;  %v1678_v43 = vpop.eup %1205  ;;  %vm1680_vm8 = vcmp.eq.f32.partialorder %v654_v19, 8.507059e+37  ;;  %v437_v56 = vsub.f32 1.0, %v436_v37  ;;  %v1687_v58 = vadd.f32 1.0, %v1204_v47  ;;  %v134_v19 = vpop.f32.mrf.mxu0 }
  0xc9   :  { %v458_v30 = vsel %vm1674_vm7, %v1616_v14, %v454_v42  ;;  %v1141_v60 = vmul.f32 -1.442695, %v218_v62  ;;  %v433_v61 = vsel %vm1624_vm0, %v432_v16, %v428_v39  ;;  %v444_v0 = vand.u32 2147483647, %v1581_v48 }
  0xca   :  { %v1208_v46 = vpop.eup %1207  ;;  %v662_v1 = vsub.f32 1.0, %v661_v40  ;;  %v462_v2 = vor.u32 1.1754944e-38, %v461_v55  ;;  %vm460_vm9 = vcmp.eq.f32.partialorder %v459_v44, 8.507059e+37  ;;  %1211 = vrcp.f32 %v1687_v58 }
  0xcb   :  { %v1210_v41 = vpop.eup %1209  ;;  %v1127_v4 = vmul.f32 -1.442695, %v197_v45  ;;  %v156_v5 = vadd.f32 %v155_v12, %v1416_v20  ;;  %v902_v6 = vrot.slane %v901_v26, 4  ;;  %v446_v7 = vand.u32 2147483648, %v1581_v48 }
  0xcc   :  { %v463_v8 = vsel %vm460_vm9, %v462_v2, %v458_v30  ;;  %v1695_v10 = vadd.f32 1.0, %v1208_v46  ;;  %v649_v11 = vadd.f32 %v1603_v3, %v648_v51  ;;  %v438_v13 = vmul.f32 %v1631_v23, %v437_v56 }
  0xcd   :  { %v1699_v14 = vadd.f32 1.0, %v1210_v41  ;;  %1213 = vpow2.f32 %v1141_v60  ;;  %v842_v15 = vmax.f32 %v433_v61, 1e-07  ;;  %v663_v17 = vmul.f32 %v1636_v9, %v662_v1 }
  0xce   :  { %v676_v18 = vmul.f32 %v1678_v43, %v1613_v57  ;;  %1215 = vrcp.f32 %v1695_v10  ;;  %vm441_vm11 = vweird.f32 %v1631_v23  ;;  %v843_v22 = vmax.f32 %v463_v8, 1e-07 }
  0xcf   :  { %1217 = vpow2.f32 %v1127_v4  ;;  %v1142_v24 = vmul.f32 -1.442695, %v156_v5  ;;  %vm1714_vm12 = vcmp.eq.f32.partialorder %v444_v0, 8.507059e+37  ;;  %v447_v27 = vor.u32 1.1754944e-38, %v446_v7  ;;  %vm1731_vm14 = vmor %vm440_vm6, %vm441_vm11 }
  0xd0   :  { %vm665_vm13 = vweird.f32 %v1592_v53  ;;  %v671_v28 = vand.u32 2147483648, %v1592_v53  ;;  %1219 = vrcp.f32 %v1699_v14  ;;  %v1721_v29 = vpop.eup %1211  ;;  %v653_v31 = vsel %vm1705_vm10, %v1603_v3, %v649_v11  ;;  %v137_v7 = vpop.f32.mrf.mxu0 }
  0xd1   :  { %v439_v32 = vadd.f32 %v1631_v23, %v438_v13  ;;  %v669_v34 = vand.u32 2147483647, %v1592_v53  ;;  %v135_v35 = vadd.f32 %v134_v19, %v1416_v20  ;;  %v664_v37 = vadd.f32 %v1636_v9, %v663_v17  ;;  %v220_v19 = vpop.f32.mrf.mxu3 }
  0xd2   :  { %vm666_vm15 = vweird.f32 %v1636_v9  ;;  %v677_v38 = vsub.f32 1.0, %v676_v18  ;;  %v466_v3 = vmul.f32 %v1721_v29, %v1687_v58  ;;  %v1739_v40 = vadd.f32 %v902_v6, %v901_v26 }
  0xd3   :  { %v1214_v39 = vpop.eup %1213  ;;  %v858_v55 = vmin.f32 %v842_v15, 0.9999999  ;;  %v1741_v62 = vmin.f32 %v843_v22, 0.9999999  ;;  %1221 = vpow2.f32 %v1142_v24  ;;  %v658_v42 = vsel %vm1680_vm8, %v1634_v63, %v653_v31  ;;  %vm1756_vm1 = vmor %vm665_vm13, %vm666_vm15 }
  0xd4   :  { %v1743_v48 = vpop.eup %1215  ;;  %v672_v44 = vor.u32 1.1754944e-38, %v671_v28  ;;  %vm680_vm0 = vweird.f32 %v1613_v57  ;;  %v467_v45 = vsub.f32 1.0, %v466_v3  ;;  %v443_v26 = vsel %vm1731_vm14, %v1631_v23, %v439_v32 }
  0xd5   :  { %v1218_v47 = vpop.eup %1217  ;;  %v686_v52 = vand.u32 2147483648, %v1613_v57  ;;  %v691_v63 = vmul.f32 %v1743_v48, %v1695_v10  ;;  %v1128_v12 = vmul.f32 -1.442695, %v135_v35  ;;  %v668_v23 = vsel %vm1756_vm1, %v1636_v9, %v664_v37  ;;  %v199_v35 = vpop.f32.mrf.mxu1 }
  0xd6   :  { %v1763_v54 = vpop.eup %1219  ;;  %v678_v56 = vmul.f32 %v1678_v43, %v677_v38  ;;  %vm681_vm2 = vweird.f32 %v1678_v43  ;;  %v468_v53 = vmul.f32 %v1721_v29, %v467_v45  ;;  %v880_v30 = vadd.f32 %v1741_v62, %v858_v55 }
  0xd7   :  { %vm470_vm3 = vweird.f32 %v1687_v58  ;;  %vm471_vm4 = vweird.f32 %v1721_v29  ;;  %v1774_v60 = vadd.f32 1.0, %v1214_v39  ;;  %v476_v46 = vand.u32 2147483648, %v1687_v58  ;;  %vm1799_vm7 = vmor %vm680_vm0, %vm681_vm2 }
  0xd8   :  { %v692_v61 = vsub.f32 1.0, %v691_v63  ;;  %v481_v9 = vmul.f32 %v1763_v54, %v1699_v14  ;;  %v1779_v0 = vadd.f32 1.0, %v1218_v47  ;;  %vm670_vm5 = vcmp.eq.f32.partialorder %v669_v34, 8.507059e+37  ;;  %vm1787_vm6 = vmor %vm470_vm3, %vm471_vm4 }
  0xd9   :  { %v1222_v1 = vpop.eup %1221  ;;  %v469_v2 = vadd.f32 %v1721_v29, %v468_v53  ;;  %v474_v41 = vand.u32 2147483647, %v1687_v58  ;;  %1223 = vpow2.f32 %v1128_v12  ;;  %v673_v4 = vsel %vm670_vm5, %v672_v44, %v668_v23 }
  0xda   :  { %v679_v5 = vadd.f32 %v1678_v43, %v678_v56  ;;  %v684_v6 = vand.u32 2147483647, %v1613_v57  ;;  %v1791_v8 = vadd.f32 1.0, %v1222_v1  ;;  %v448_v11 = vsel %vm1714_vm12, %v447_v27, %v443_v26 }
  0xdb   :  { %v881_v13 = vrot.slane %v880_v30, 4  ;;  %v687_v16 = vor.u32 1.1754944e-38, %v686_v52  ;;  %1225 = vrcp.f32 %v1774_v60  ;;  %v477_v58 = vor.u32 1.1754944e-38, %v476_v46  ;;  %v158_v46 = vpop.f32.mrf.mxu2 }
  0xdc   :  { %v693_v17 = vmul.f32 %v1743_v48, %v692_v61  ;;  %v482_v18 = vsub.f32 1.0, %v481_v9  ;;  %1227 = vrcp.f32 %v1779_v0  ;;  %v850_v22 = vmax.f32 %v673_v4, 1e-07 }
  0xdd   :  { %v473_v24 = vsel %vm1787_vm6, %v1721_v29, %v469_v2  ;;  %vm475_vm8 = vcmp.eq.f32.partialorder %v474_v41, 8.507059e+37  ;;  %1229 = vrcp.f32 %v1791_v8  ;;  %v904_v57 = vrot.slane %v1739_v40, 2 }
  0xde   :  { %v1812_v25 = vmul.f32 %v1640_v33, %v658_v42  ;;  %v683_v27 = vsel %vm1799_vm7, %v1678_v43, %v679_v5  ;;  %vm685_vm9 = vcmp.eq.f32.partialorder %v684_v6, 8.507059e+37  ;;  %v957_v31 = vmul.f32 %v858_v55, %v448_v11 }
  0xdf   :  { %v1224_v28 = vpop.eup %1223  ;;  %v882_v32 = vadd.f32 %v881_v13, %v880_v30  ;;  %v699_v34 = vand.u32 2147483647, %v1695_v10  ;;  %v221_v29 = vadd.f32 %v220_v19, %v1418_v21  ;;  %v478_v36 = vsel %vm475_vm8, %v477_v58, %v473_v24 }
  0xe0   :  { %v694_v37 = vadd.f32 %v1743_v48, %v693_v17  ;;  %vm696_vm10 = vweird.f32 %v1743_v48  ;;  %v483_v33 = vmul.f32 %v1763_v54, %v482_v18  ;;  %v1824_v3 = vmin.f32 %v850_v22, 0.9999999  ;;  %v202_v18 = vpop.f32.mrf.mxu1 }
  0xe1   :  { %v1822_v38 = vpop.eup %1225  ;;  %v1826_v43 = vsel %vm685_vm9, %v687_v16, %v683_v27  ;;  %vm695_vm11 = vweird.f32 %v1695_v10  ;;  %v701_v39 = vand.u32 2147483648, %v1695_v10  ;;  %vm485_vm12 = vweird.f32 %v1699_v14 }
  0xe2   :  { %v1830_v55 = vpop.eup %1227  ;;  %v489_v42 = vand.u32 2147483647, %v1699_v14  ;;  %v491_v44 = vand.u32 2147483648, %v1699_v14  ;;  %v1835_v45 = vadd.f32 1.0, %v1224_v28  ;;  %v883_v26 = vrot.slane %v882_v32, 2  ;;  %vm1842_vm13 = vmor %vm695_vm11, %vm696_vm10 }
  0xe3   :  { %v1837_v47 = vpop.eup %1229  ;;  %v958_v51 = vmul.f32 %v1741_v62, %v478_v36  ;;  %vm1846_vm14 = vcmp.eq.f32.partialorder %v699_v34, 8.507059e+37  ;;  %v1143_v63 = vmul.f32 -1.442695, %v221_v29  ;;  %v698_v12 = vsel %vm1842_vm13, %v1743_v48, %v694_v37 }
  0xe4   :  { %v484_v23 = vadd.f32 %v1763_v54, %v483_v33  ;;  %vm486_vm15 = vweird.f32 %v1763_v54  ;;  %v706_v62 = vmul.f32 %v1822_v38, %v1774_v60  ;;  %v702_v56 = vor.u32 1.1754944e-38, %v701_v39 }
  0xe5   :  { %v506_v53 = vand.u32 2147483648, %v1779_v0  ;;  %v721_v30 = vmul.f32 %v1837_v47, %v1791_v8  ;;  %1231 = vrcp.f32 %v1835_v45  ;;  %vm1861_vm0 = vcmp.eq.f32.partialorder %v489_v42, 8.507059e+37  ;;  %vm1876_vm1 = vmor %vm485_vm12, %vm486_vm15 }
  0xe6   :  { %v492_v48 = vor.u32 1.1754944e-38, %v491_v44  ;;  %v714_v9 = vand.u32 2147483647, %v1774_v60  ;;  %v496_v1 = vmul.f32 %v1830_v55, %v1779_v0  ;;  %v1868_v2 = vadd.f32 %v883_v26, %v882_v32 }
  0xe7   :  { %v1870_v41 = vadd.f32 %v958_v51, %v957_v31  ;;  %v703_v4 = vsel %vm1846_vm14, %v702_v56, %v698_v12  ;;  %v716_v6 = vand.u32 2147483648, %v1774_v60  ;;  %v488_v11 = vsel %vm1876_vm1, %v1763_v54, %v484_v23  ;;  %v161_v23 = vpop.f32.mrf.mxu2 }
  0xe8   :  { %v707_v13 = vsub.f32 1.0, %v706_v62  ;;  %1233 = vpow2.f32 %v1143_v63  ;;  %v200_v15 = vadd.f32 %v199_v35, %v1418_v21  ;;  %v504_v16 = vand.u32 2147483647, %v1779_v0  ;;  %v223_v35 = vpop.f32.mrf.mxu3 }
  0xe9   :  { %v1886_v58 = vor.u32 1.1754944e-38, %v506_v53  ;;  %v722_v14 = vsub.f32 1.0, %v721_v30  ;;  %v159_v17 = vadd.f32 %v158_v46, %v1416_v20  ;;  %v851_v19 = vmax.f32 %v703_v4, 1e-07 }
  0xea   :  { %v497_v22 = vsub.f32 1.0, %v496_v1  ;;  %vm500_vm2 = vweird.f32 %v1779_v0  ;;  %v1129_v24 = vmul.f32 -1.442695, %v200_v15  ;;  %v138_v27 = vadd.f32 %v137_v7, %v1416_v20 }
  0xeb   :  { %v1232_v54 = vpop.eup %1231  ;;  %v979_v28 = vrot.slane %v1870_v41, 4  ;;  %v1894_v31 = vsel %vm1861_vm0, %v492_v48, %v488_v11  ;;  %vm501_vm3 = vweird.f32 %v1830_v55  ;;  %vm725_vm4 = vweird.f32 %v1791_v8 }
  0xec   :  { %v1144_v32 = vmul.f32 -1.442695, %v159_v17  ;;  %v708_v34 = vmul.f32 %v1822_v38, %v707_v13  ;;  %vm710_vm5 = vweird.f32 %v1774_v60  ;;  %vm711_vm6 = vweird.f32 %v1822_v38  ;;  %vm1950_vm14 = vmor %vm500_vm2, %vm501_vm3 }
  0xed   :  { %v511_v29 = vmul.f32 %v1232_v54, %v1835_v45  ;;  %1235 = vpow2.f32 %v1129_v24  ;;  %v203_v36 = vadd.f32 %v202_v18, %v1418_v21  ;;  %v723_v37 = vmul.f32 %v1837_v47, %v722_v14  ;;  %vm1963_vm15 = vmor %vm710_vm5, %vm711_vm6 }
  0xee   :  { %v729_v33 = vand.u32 2147483647, %v1791_v8  ;;  %1237 = vpow2.f32 %v1144_v32  ;;  %v1130_v39 = vmul.f32 -1.442695, %v138_v27  ;;  %v1234_v42 = vpop.eup %1233  ;;  %v1905_v44 = vmin.f32 %v851_v19, 0.9999999  ;;  %v140_v19 = vpop.f32.mrf.mxu0 }
  0xef   :  { %v844_v26 = vmax.f32 %v1894_v31, 1e-07  ;;  %v498_v51 = vmul.f32 %v1830_v55, %v497_v22  ;;  %v512_v52 = vsub.f32 1.0, %v511_v29  ;;  %v521_v10 = vand.u32 2147483648, %v1835_v45  ;;  %v164_v1 = vpop.f32.mrf.mxu2 }
  0xf0   :  { %v1910_v63 = vadd.f32 1.0, %v1234_v42  ;;  %1239 = vpow2.f32 %v1130_v39  ;;  %v224_v12 = vadd.f32 %v223_v35, %v1418_v21  ;;  %vm516_vm7 = vweird.f32 %v1232_v54  ;;  %v226_v60 = vpop.f32.mrf.mxu3 }
  0xf1   :  { %v513_v62 = vmul.f32 %v1232_v54, %v512_v52  ;;  %v519_v56 = vand.u32 2147483647, %v1835_v45  ;;  %v1131_v53 = vmul.f32 -1.442695, %v203_v36  ;;  %v1915_v30 = vadd.f32 %v1822_v38, %v708_v34 }
  0xf2   :  { %v724_v46 = vadd.f32 %v1837_v47, %v723_v37  ;;  %vm726_vm8 = vweird.f32 %v1837_v47  ;;  %v731_v61 = vand.u32 2147483648, %v1791_v8  ;;  %vm1920_vm9 = vcmp.eq.f32.partialorder %v714_v9, 8.507059e+37 }
  0xf3   :  { %v1236_v48 = vpop.eup %1235  ;;  %v499_v4 = vadd.f32 %v1830_v55, %v498_v51  ;;  %v514_v5 = vadd.f32 %v1232_v54, %v513_v62  ;;  %vm515_vm10 = vweird.f32 %v1835_v45  ;;  %v162_v7 = vadd.f32 %v161_v23, %v1416_v20  ;;  %vm1936_vm12 = vmor %vm725_vm4, %vm726_vm8 }
  0xf4   :  { %v1238_v11 = vpop.eup %1237  ;;  %vm1927_vm11 = vmor %vm515_vm10, %vm516_vm7  ;;  %v522_v15 = vor.u32 1.1754944e-38, %v521_v10  ;;  %1241 = vrcp.f32 %v1910_v63  ;;  %v1932_v14 = vadd.f32 1.0, %v1236_v48  ;;  %v1145_v9 = vmul.f32 -1.442695, %v224_v12 }
  0xf5   :  { %v518_v45 = vsel %vm1927_vm11, %v1232_v54, %v514_v5  ;;  %vm520_vm13 = vcmp.eq.f32.partialorder %v519_v56, 8.507059e+37  ;;  %v1942_v18 = vadd.f32 1.0, %v1238_v11  ;;  %1243 = vpow2.f32 %v1131_v53 }
  0xf6   :  { %v1240_v22 = vpop.eup %1239  ;;  %v908_v24 = vadd.f32 %v1905_v44, %v1824_v3  ;;  %v728_v27 = vsel %vm1936_vm12, %v1837_v47, %v724_v46  ;;  %v523_v54 = vsel %vm520_vm13, %v522_v15, %v518_v45  ;;  %1245 = vrcp.f32 %v1932_v14 }
  0xf7   :  { %v732_v31 = vor.u32 1.1754944e-38, %v731_v61  ;;  %v845_v32 = vmax.f32 %v523_v54, 1e-07  ;;  %1247 = vrcp.f32 %v1942_v18  ;;  %v1146_v34 = vmul.f32 -1.442695, %v162_v7 }
  0xf8   :  { %vm730_vm0 = vcmp.eq.f32.partialorder %v729_v33, 8.507059e+37  ;;  %v1967_v35 = vadd.f32 1.0, %v1240_v22  ;;  %1249 = vpow2.f32 %v1145_v9  ;;  %v141_v47 = vadd.f32 %v140_v19, %v1416_v20 }
  0xf9   :  { %v717_v36 = vor.u32 1.1754944e-38, %v716_v6  ;;  %v503_v37 = vsel %vm1950_vm14, %v1830_v55, %v499_v4  ;;  %vm505_vm1 = vcmp.eq.f32.partialorder %v504_v16, 8.507059e+37  ;;  %v733_v39 = vsel %vm730_vm0, %v732_v31, %v728_v27  ;;  %v205_v4 = vpop.f32.mrf.mxu1 }
  0xfa   :  { %v1977_v42 = vpop.eup %1241  ;;  %v885_v33 = vrot.slane %v1868_v2, 1  ;;  %v1983_v51 = vadd.f32 %v979_v28, %v1870_v41  ;;  %v860_v52 = vmin.f32 %v844_v26, 0.9999999  ;;  %1251 = vrcp.f32 %v1967_v35 }
  0xfb   :  { %v1244_v6 = vpop.eup %1243  ;;  %v909_v10 = vrot.slane %v908_v24, 4  ;;  %v713_v0 = vsel %vm1963_vm15, %v1822_v38, %v1915_v30  ;;  %v1990_v55 = vmin.f32 %v845_v32, 0.9999999  ;;  %1253 = vpow2.f32 %v1146_v34 }
  0xfc   :  { %v1992_v16 = vpop.eup %1245  ;;  %v1996_v41 = vadd.f32 %v1812_v25, %v1611_v59  ;;  %v508_v28 = vsel %vm505_vm1, %v1886_v58, %v503_v37  ;;  %v852_v26 = vmax.f32 %v733_v39, 1e-07  ;;  %v1132_v12 = vmul.f32 -1.442695, %v141_v47 }
  0xfd   :  { %v1999_v23 = vpop.eup %1247  ;;  %v2003_v62 = vmul.f32 %v1824_v3, %v1826_v43  ;;  %v736_v38 = vmul.f32 %v1977_v42, %v1910_v63  ;;  %v526_v56 = vmul.f32 %v1992_v16, %v1932_v14  ;;  %v227_v53 = vadd.f32 %v226_v60, %v1418_v21 }
  0xfe   :  { %v1250_v59 = vpop.eup %1249  ;;  %v2011_v25 = vadd.f32 %v885_v33, %v1868_v2  ;;  %v981_v58 = vrot.slane %v1983_v51, 2  ;;  %v2016_v30 = vsel %vm1920_vm9, %v717_v36, %v713_v0  ;;  %v751_v3 = vmul.f32 %v1999_v23, %v1942_v18 }
  0xff   :  { %v2020_v43 = vadd.f32 %v909_v10, %v908_v24  ;;  %v2022_v46 = vmul.f32 %v860_v52, %v508_v28  ;;  %v887_v61 = vadd.f32 %v1990_v55, %v860_v52  ;;  %v527_v48 = vsub.f32 1.0, %v526_v56 }
 0x100   :  { %v2025_v5 = vpop.eup %1251  ;;  %v2027_v2 = vmin.f32 %v852_v26, 0.9999999  ;;  %v752_v7 = vsub.f32 1.0, %v751_v3  ;;  %v2029_v11 = vadd.f32 1.0, %v1244_v6  ;;  %1255 = vpow2.f32 %v1132_v12 }
 0x101   :  { %v1254_v13 = vpop.eup %1253  ;;  %v737_v15 = vsub.f32 1.0, %v736_v38  ;;  %v744_v9 = vand.u32 2147483647, %v1910_v63  ;;  %v2032_v17 = vadd.f32 1.0, %v1250_v59  ;;  %v2034_v45 = vmul.f32 -1.442695, %v227_v53 }
 0x102   :  { %vm740_vm2 = vweird.f32 %v1910_v63  ;;  %v746_v19 = vand.u32 2147483648, %v1910_v63  ;;  %v528_v22 = vmul.f32 %v1992_v16, %v527_v48  ;;  %v206_v24 = vadd.f32 %v205_v4, %v1418_v21 }
 0x103   :  { %v888_v8 = vrot.slane %v887_v61, 4  ;;  %v753_v27 = vmul.f32 %v1999_v23, %v752_v7  ;;  %v541_v54 = vmul.f32 %v2025_v5, %v1967_v35  ;;  %v2044_v31 = vadd.f32 %v164_v1, %v1416_v20 }
 0x104   :  { %vm530_vm3 = vweird.f32 %v1932_v14  ;;  %vm531_vm4 = vweird.f32 %v1992_v16  ;;  %1257 = vrcp.f32 %v2029_v11  ;;  %v2049_v32 = vadd.f32 1.0, %v1254_v13 }
 0x105   :  { %v738_v34 = vmul.f32 %v1977_v42, %v737_v15  ;;  %vm2052_vm5 = vcmp.eq.f32.partialorder %v744_v9, 8.507059e+37  ;;  %v536_v47 = vand.u32 2147483648, %v1932_v14  ;;  %1259 = vrcp.f32 %v2032_v17  ;;  %vm2062_vm7 = vmor %vm530_vm3, %vm531_vm4 }
 0x106   :  { %v1256_v20 = vpop.eup %1255  ;;  %vm741_vm6 = vweird.f32 %v1977_v42  ;;  %v529_v36 = vadd.f32 %v1992_v16, %v528_v22  ;;  %v534_v37 = vand.u32 2147483647, %v1932_v14  ;;  %v759_v39 = vand.u32 2147483647, %v1942_v18 }
 0x107   :  { %v889_v33 = vadd.f32 %v888_v8, %v887_v61  ;;  %v754_v60 = vadd.f32 %v1999_v23, %v753_v27  ;;  %vm756_vm8 = vweird.f32 %v1999_v23  ;;  %v542_v6 = vsub.f32 1.0, %v541_v54  ;;  %vm2075_vm10 = vmor %vm740_vm2, %vm741_vm6 }
 0x108   :  { %vm755_vm9 = vweird.f32 %v1942_v18  ;;  %v761_v10 = vand.u32 2147483648, %v1942_v18  ;;  %v551_v0 = vand.u32 2147483648, %v1967_v35  ;;  %1261 = vrcp.f32 %v2049_v32 }
 0x109   :  { %v739_v14 = vadd.f32 %v1977_v42, %v738_v34  ;;  %v537_v26 = vor.u32 1.1754944e-38, %v536_v47  ;;  %v549_v12 = vand.u32 2147483647, %v1967_v35  ;;  %v2080_v38 = vadd.f32 1.0, %v1256_v20  ;;  %vm2089_vm12 = vmor %vm755_vm9, %vm756_vm8  ;;  %v229_v34 = vpop.f32.mrf.mxu3 }
 0x10a   :  { %v2082_v56 = vpop.eup %1257  ;;  %v747_v18 = vor.u32 1.1754944e-38, %v746_v19  ;;  %v533_v53 = vsel %vm2062_vm7, %v1992_v16, %v529_v36  ;;  %vm535_vm11 = vcmp.eq.f32.partialorder %v534_v37, 8.507059e+37  ;;  %v1133_v59 = vmul.f32 -1.442695, %v206_v24 }
 0x10b   :  { %v2093_v3 = vpop.eup %1259  ;;  %v890_v61 = vrot.slane %v889_v33, 2  ;;  %v758_v48 = vsel %vm2089_vm12, %v1999_v23, %v754_v60  ;;  %vm760_vm13 = vcmp.eq.f32.partialorder %v759_v39, 8.507059e+37  ;;  %v543_v4 = vmul.f32 %v2025_v5, %v542_v6 }
 0x10c   :  { %v762_v7 = vor.u32 1.1754944e-38, %v761_v10  ;;  %vm545_vm14 = vweird.f32 %v1967_v35  ;;  %v552_v16 = vor.u32 1.1754944e-38, %v551_v0  ;;  %v776_v1 = vand.u32 2147483648, %v2032_v17 }
 0x10d   :  { %v743_v13 = vsel %vm2075_vm10, %v1977_v42, %v739_v14  ;;  %v538_v15 = vsel %vm535_vm11, %v537_v26, %v533_v53  ;;  %vm2104_vm15 = vcmp.eq.f32.partialorder %v549_v12, 8.507059e+37  ;;  %v556_v23 = vmul.f32 %v2082_v56, %v2029_v11 }
 0x10e   :  { %1263 = vrcp.f32 %v2080_v38  ;;  %v2111_v19 = vpop.eup %1261  ;;  %v763_v22 = vsel %vm760_vm13, %v762_v7, %v758_v48  ;;  %v766_v24 = vmul.f32 %v2093_v3, %v2032_v17  ;;  %vm770_vm0 = vweird.f32 %v2032_v17 }
 0x10f   :  { %v774_v42 = vand.u32 2147483647, %v2032_v17  ;;  %v2117_v8 = vadd.f32 %v890_v61, %v889_v33  ;;  %v544_v27 = vadd.f32 %v2025_v5, %v543_v4  ;;  %vm546_vm1 = vweird.f32 %v2025_v5 }
 0x110   :  { %v781_v54 = vmul.f32 %v2111_v19, %v2049_v32  ;;  %v2125_v47 = vsel %vm2052_vm5, %v747_v18, %v743_v13  ;;  %v960_v20 = vmul.f32 %v1990_v55, %v538_v15  ;;  %v2128_v36 = vor.u32 1.1754944e-38, %v776_v1  ;;  %vm2135_vm2 = vmor %vm545_vm14, %vm546_vm1 }
 0x111   :  { %v564_v37 = vand.u32 2147483647, %v2029_v11  ;;  %v853_v39 = vmax.f32 %v763_v22, 1e-07  ;;  %v557_v33 = vsub.f32 1.0, %v556_v23  ;;  %1265 = vpow2.f32 %v2034_v45 }
 0x112   :  { %v1148_v52 = vmul.f32 -1.442695, %v2044_v31  ;;  %v767_v29 = vsub.f32 1.0, %v766_v24  ;;  %vm560_vm3 = vweird.f32 %v2029_v11  ;;  %1267 = vpow2.f32 %v1133_v59 }
 0x113   :  { %v230_v55 = vadd.f32 %v229_v34, %v1418_v21  ;;  %v892_v10 = vrot.slane %v2117_v8, 1  ;;  %v548_v45 = vsel %vm2135_vm2, %v2025_v5, %v544_v27  ;;  %vm771_vm4 = vweird.f32 %v2093_v3 }
 0x114   :  { %v1264_v6 = vpop.eup %1263  ;;  %v782_v35 = vsub.f32 1.0, %v781_v54  ;;  %v566_v31 = vand.u32 2147483648, %v2029_v11  ;;  %1269 = vpow2.f32 %v1148_v52  ;;  %v2149_v28 = vadd.f32 %v960_v20, %v2022_v46  ;;  %vm2179_vm10 = vmor %vm770_vm0, %vm771_vm4 }
 0x115   :  { %v571_v0 = vmul.f32 %v1264_v6, %v2080_v38  ;;  %v1149_v14 = vmul.f32 -1.442695, %v230_v55  ;;  %v2151_v21 = vmin.f32 %v853_v39, 0.9999999  ;;  %v558_v26 = vmul.f32 %v2082_v56, %v557_v33 }
 0x116   :  { %vm2154_vm5 = vcmp.eq.f32.partialorder %v564_v37, 8.507059e+37  ;;  %vm785_vm6 = vweird.f32 %v2049_v32  ;;  %v553_v5 = vsel %vm2104_vm15, %v552_v16, %v548_v45  ;;  %v768_v18 = vmul.f32 %v2093_v3, %v767_v29 }
 0x117   :  { %vm2162_vm7 = vcmp.eq.f32.partialorder %v774_v42, 8.507059e+37  ;;  %v572_v46 = vsub.f32 1.0, %v571_v0  ;;  %1271 = vpow2.f32 %v1149_v14  ;;  %v1266_v63 = vpop.eup %1265  ;;  %vm561_vm8 = vweird.f32 %v2082_v56 }
 0x118   :  { %v783_v59 = vmul.f32 %v2111_v19, %v782_v35  ;;  %v789_v61 = vand.u32 2147483647, %v2049_v32  ;;  %v581_v48 = vand.u32 2147483648, %v2080_v38  ;;  %v1268_v4 = vpop.eup %1267  ;;  %vm576_vm9 = vweird.f32 %v1264_v6  ;;  %vm2191_vm11 = vmor %vm560_vm3, %vm561_vm8 }
 0x119   :  { %v573_v7 = vmul.f32 %v1264_v6, %v572_v46  ;;  %v579_v16 = vand.u32 2147483647, %v2080_v38  ;;  %v2171_v1 = vadd.f32 1.0, %v1266_v63  ;;  %v915_v13 = vadd.f32 %v2151_v21, %v2027_v2 }
 0x11a   :  { %v846_v15 = vmax.f32 %v553_v5, 1e-07  ;;  %v559_v23 = vadd.f32 %v2082_v56, %v558_v26  ;;  %v2184_v22 = vadd.f32 1.0, %v1268_v4  ;;  %v1270_v24 = vpop.eup %1269  ;;  %v769_v42 = vadd.f32 %v2093_v3, %v768_v18 }
 0x11b   :  { %v574_v17 = vadd.f32 %v1264_v6, %v573_v7  ;;  %vm575_vm12 = vweird.f32 %v2080_v38  ;;  %1273 = vrcp.f32 %v2171_v1  ;;  %v784_v54 = vadd.f32 %v2111_v19, %v783_v59 }
 0x11c   :  { %vm786_vm13 = vweird.f32 %v2111_v19  ;;  %vm577_vm14 = vmor %vm575_vm12, %vm576_vm9  ;;  %v582_v34 = vor.u32 1.1754944e-38, %v581_v48  ;;  %1275 = vrcp.f32 %v2184_v22  ;;  %v567_v11 = vor.u32 1.1754944e-38, %v566_v31 }
 0x11d   :  { %v1272_v20 = vpop.eup %1271  ;;  %v791_v37 = vand.u32 2147483648, %v2049_v32  ;;  %v578_v39 = vsel %vm577_vm14, %v1264_v6, %v574_v17  ;;  %vm580_vm15 = vcmp.eq.f32.partialorder %v579_v16, 8.507059e+37  ;;  %v563_v38 = vsel %vm2191_vm11, %v2082_v56, %v559_v23  ;;  %vm2217_vm0 = vmor %vm785_vm6, %vm786_vm13 }
 0x11e   :  { %v583_v33 = vsel %vm580_vm15, %v582_v34, %v578_v39  ;;  %v2205_v52 = vadd.f32 1.0, %v1270_v24  ;;  %v2207_v60 = vadd.f32 1.0, %v1272_v20  ;;  %v986_v29 = vrot.slane %v2149_v28, 4 }
 0x11f   :  { %v773_v55 = vsel %vm2179_vm10, %v2093_v3, %v769_v42  ;;  %vm2221_vm1 = vcmp.eq.f32.partialorder %v789_v61, 8.507059e+37  ;;  %v847_v45 = vmax.f32 %v583_v33, 1e-07  ;;  %v862_v35 = vmin.f32 %v846_v15, 0.9999999 }
 0x120   :  { %v788_v31 = vsel %vm2217_vm0, %v2111_v19, %v784_v54  ;;  %1277 = vrcp.f32 %v2205_v52  ;;  %v916_v3 = vrot.slane %v915_v13, 4  ;;  %v568_v32 = vsel %vm2154_vm5, %v567_v11, %v563_v38 }
 0x121   :  { %v2229_v0 = vpop.eup %1273  ;;  %v792_v14 = vor.u32 1.1754944e-38, %v791_v37  ;;  %v863_v26 = vmin.f32 %v847_v45, 0.9999999  ;;  %1279 = vrcp.f32 %v2207_v60  ;;  %v2237_v18 = vsel %vm2162_vm7, %v2128_v36, %v773_v55 }
 0x122   :  { %v1276_v5 = vpop.eup %1275  ;;  %v796_v19 = vmul.f32 %v2229_v0, %v2171_v1  ;;  %v594_v46 = vand.u32 2147483647, %v2184_v22  ;;  %v2245_v12 = vadd.f32 %v904_v57, %v1739_v40  ;;  %v596_v36 = vand.u32 2147483648, %v2184_v22 }
 0x123   :  { %v2249_v63 = vsel %vm2221_vm1, %v792_v14, %v788_v31  ;;  %v894_v59 = vadd.f32 %v863_v26, %v862_v35  ;;  %v586_v61 = vmul.f32 %v1276_v5, %v2184_v22  ;;  %v961_v53 = vmul.f32 %v862_v35, %v568_v32 }
 0x124   :  { %v797_v48 = vsub.f32 1.0, %v796_v19  ;;  %v911_v4 = vrot.slane %v2020_v43, 2  ;;  %v2254_v7 = vadd.f32 %v916_v3, %v915_v13  ;;  %vm590_vm2 = vweird.f32 %v2184_v22 }
 0x125   :  { %v895_v16 = vrot.slane %v894_v59, 4  ;;  %v587_v15 = vsub.f32 1.0, %v586_v61  ;;  %vm591_vm3 = vweird.f32 %v1276_v5  ;;  %v854_v57 = vmax.f32 %v2249_v63, 1e-07 }
 0x126   :  { %v1278_v40 = vpop.eup %1277  ;;  %vm800_vm4 = vweird.f32 %v2171_v1  ;;  %v806_v9 = vand.u32 2147483648, %v2171_v1  ;;  %vm2260_vm5 = vcmp.eq.f32.partialorder %v594_v46, 8.507059e+37  ;;  %v597_v27 = vor.u32 1.1754944e-38, %v596_v36  ;;  %vm2266_vm6 = vmor %vm590_vm2, %vm591_vm3 }
 0x127   :  { %v1280_v24 = vpop.eup %1279  ;;  %v896_v42 = vadd.f32 %v895_v16, %v894_v59  ;;  %v588_v13 = vmul.f32 %v1276_v5, %v587_v15  ;;  %v811_v17 = vmul.f32 %v1278_v40, %v2205_v52  ;;  %v798_v22 = vmul.f32 %v2229_v0, %v797_v48 }
 0x128   :  { %v819_v34 = vand.u32 2147483647, %v2205_v52  ;;  %v821_v20 = vand.u32 2147483648, %v2205_v52  ;;  %v826_v11 = vmul.f32 %v1280_v24, %v2207_v60  ;;  %vm801_vm7 = vweird.f32 %v2229_v0 }
 0x129   :  { %v897_v37 = vrot.slane %v896_v42, 2  ;;  %v589_v39 = vadd.f32 %v1276_v5, %v588_v13  ;;  %v812_v38 = vsub.f32 1.0, %v811_v17  ;;  %vm830_vm8 = vweird.f32 %v2207_v60  ;;  %vm2282_vm11 = vmor %vm800_vm4, %vm801_vm7 }
 0x12a   :  { %v827_v33 = vsub.f32 1.0, %v826_v11  ;;  %vm831_vm9 = vweird.f32 %v1280_v24  ;;  %v836_v55 = vand.u32 2147483648, %v2207_v60  ;;  %vm816_vm10 = vweird.f32 %v1278_v40 }
 0x12b   :  { %v593_v6 = vsel %vm2266_vm6, %v1276_v5, %v589_v39  ;;  %v813_v56 = vmul.f32 %v1278_v40, %v812_v38  ;;  %v834_v45 = vand.u32 2147483647, %v2207_v60  ;;  %v799_v35 = vadd.f32 %v2229_v0, %v798_v22  ;;  %vm2293_vm13 = vmor %vm830_vm8, %vm831_vm9 }
 0x12c   :  { %v804_v3 = vand.u32 2147483647, %v2171_v1  ;;  %v598_v32 = vsel %vm2260_vm5, %v597_v27, %v593_v6  ;;  %v828_v14 = vmul.f32 %v1280_v24, %v827_v33  ;;  %v898_v19 = vadd.f32 %v897_v37, %v896_v42 }
 0x12d   :  { %v962_v5 = vmul.f32 %v863_v26, %v598_v32  ;;  %v814_v46 = vadd.f32 %v1278_v40, %v813_v56  ;;  %vm815_vm12 = vweird.f32 %v2205_v52  ;;  %v807_v59 = vor.u32 1.1754944e-38, %v806_v9 }
 0x12e   :  { %vm817_vm14 = vmor %vm815_vm12, %vm816_vm10  ;;  %v822_v61 = vor.u32 1.1754944e-38, %v821_v20  ;;  %v829_v1 = vadd.f32 %v1280_v24, %v828_v14  ;;  %v837_v36 = vor.u32 1.1754944e-38, %v836_v55  ;;  %vm820_vm15 = vcmp.eq.f32.partialorder %v819_v34, 8.507059e+37 }
 0x12f   :  { %v992_v48 = vadd.f32 %v962_v5, %v961_v53  ;;  %v818_v16 = vsel %vm817_vm14, %v1278_v40, %v814_v46  ;;  %vm835_vm0 = vcmp.eq.f32.partialorder %v834_v45, 8.507059e+37  ;;  %v803_v52 = vsel %vm2282_vm11, %v2229_v0, %v799_v35 }
 0x130   :  { %vm805_vm1 = vcmp.eq.f32.partialorder %v804_v3, 8.507059e+37  ;;  %v823_v26 = vsel %vm820_vm15, %v822_v61, %v818_v16  ;;  %v833_v60 = vsel %vm2293_vm13, %v1280_v24, %v829_v1  ;;  %v966_v15 = vmul.f32 %v1905_v44, %v2016_v30 }
 0x131   :  { %v967_v9 = vmul.f32 %v2027_v2, %v2125_v47  ;;  %v855_v23 = vmax.f32 %v823_v26, 1e-07  ;;  %v899_v53 = vrot.slane %v898_v19, 1  ;;  %v987_v40 = vadd.f32 %v986_v29, %v2149_v28 }
 0x132   :  { %v870_v42 = vmin.f32 %v854_v57, 0.9999999  ;;  %v993_v13 = vrot.slane %v992_v48, 4  ;;  %v838_v0 = vsel %vm835_vm0, %v837_v36, %v833_v60  ;;  %v968_v27 = vmul.f32 %v2151_v21, %v2237_v18 }
 0x133   :  { %v808_v17 = vsel %vm805_vm1, %v807_v59, %v803_v52  ;;  %v871_v24 = vmin.f32 %v855_v23, 0.9999999  ;;  %v893_v44 = vadd.f32 %v892_v10, %v2117_v8  ;;  %v906_v30 = vrot.slane %v2245_v12, 1 }
 0x134   :  { %v912_v2 = vadd.f32 %v911_v4, %v2020_v43  ;;  %v918_v47 = vrot.slane %v2254_v7, 2  ;;  %vm937_vm2 = vcmask 1041409   ;;  %v900_v28 = vadd.f32 %v899_v53, %v898_v19 }
 0x135   :  { %v922_v29 = vadd.f32 %v871_v24, %v870_v42  ;;  %vm939_vm3 = vcmask 1042434   ;;  %v970_v57 = vmul.f32 %v871_v24, %v838_v0  ;;  %vm941_vm4 = vcmask 1043459  }
 0x136   :  { %v969_v21 = vmul.f32 %v870_v42, %v808_v17  ;;  %v994_v18 = vadd.f32 %v993_v13, %v992_v48  ;;  %v1006_v22 = vadd.f32 %v966_v15, %v2003_v62  ;;  %v988_v54 = vrot.slane %v987_v40, 2 }
 0x137   :  { %v923_v8 = vrot.slane %v922_v29, 4  ;;  %v938_v10 = vsel %vm937_vm2, %v2011_v25, %v1666_v50  ;;  %v1000_v43 = vrot.slane %v1996_v41, 4  ;;  %v913_v4 = vrot.slane %v912_v2, 1 }
 0x138   :  { %v919_v34 = vadd.f32 %v918_v47, %v2254_v7  ;;  %v940_v20 = vsel %vm939_vm3, %v893_v44, %v938_v10  ;;  %v1020_v11 = vadd.f32 %v970_v57, %v969_v21  ;;  %vm943_vm5 = vcmask 1044484  }
 0x139   :  { %v924_v37 = vadd.f32 %v923_v8, %v922_v29  ;;  %v942_v39 = vsel %vm941_vm4, %v900_v28, %v940_v20  ;;  %v1013_v38 = vadd.f32 %v968_v27, %v967_v9  ;;  %v974_v62 = vrot.slane %v1621_v49, 2 }
 0x13a   :  { %v907_v33 = vadd.f32 %v906_v30, %v2245_v12  ;;  %v995_v55 = vrot.slane %v994_v18, 2  ;;  %v1007_v6 = vrot.slane %v1006_v22, 4  ;;  %v982_v50 = vadd.f32 %v981_v58, %v1983_v51 }
 0x13b   :  { %v925_v25 = vrot.slane %v924_v37, 2  ;;  %v1001_v7 = vadd.f32 %v1000_v43, %v1996_v41  ;;  %v920_v56 = vrot.slane %v919_v34, 1  ;;  %vm945_vm6 = vcmask 1045509  }
 0x13c   :  { %v944_v45 = vsel %vm943_vm5, %v907_v33, %v942_v39  ;;  %v1021_v35 = vrot.slane %v1020_v11, 4  ;;  %v914_v31 = vadd.f32 %v913_v4, %v912_v2  ;;  %v989_v32 = vadd.f32 %v988_v54, %v987_v40 }
 0x13d   :  { %v926_v3 = vadd.f32 %v925_v25, %v924_v37  ;;  %v1014_v14 = vrot.slane %v1013_v38, 4  ;;  %v975_v12 = vadd.f32 %v974_v62, %v1621_v49  ;;  %v996_v19 = vadd.f32 %v995_v55, %v994_v18 }
 0x13e   :  { %v1008_v5 = vadd.f32 %v1007_v6, %v1006_v22  ;;  %v946_v63 = vsel %vm945_vm6, %v914_v31, %v944_v45  ;;  %vm947_vm7 = vcmask 1046534   ;;  %v1002_v51 = vrot.slane %v1001_v7, 2 }
 0x13f   :  { %v927_v46 = vrot.slane %v926_v3, 1  ;;  %v921_v58 = vadd.f32 %v920_v56, %v919_v34  ;;  %vm949_vm8 = vcmask 1047559   ;;  %v983_v41 = vrot.slane %v982_v50, 1 }
 0x140   :  { %v1022_v59 = vadd.f32 %v1021_v35, %v1020_v11  ;;  %v990_v1 = vrot.slane %v989_v32, 1  ;;  %v1015_v36 = vadd.f32 %v1014_v14, %v1013_v38  ;;  %v976_v16 = vrot.slane %v975_v12, 1 }
 0x141   :  { %v928_v61 = vadd.f32 %v927_v46, %v926_v3  ;;  %v948_v48 = vsel %vm947_vm7, %v921_v58, %v946_v63  ;;  %v997_v52 = vrot.slane %v996_v19, 1  ;;  %v1009_v26 = vrot.slane %v1008_v5, 2 }
 0x142   :  { %v1003_v60 = vadd.f32 %v1002_v51, %v1001_v7  ;;  %v984_v15 = vadd.f32 %v983_v41, %v982_v50  ;;  %v1023_v9 = vrot.slane %v1022_v59, 2  ;;  %v991_v23 = vadd.f32 %v990_v1, %v989_v32 }
 0x143   :  { %v950_v49 = vsel %vm949_vm8, %v928_v61, %v948_v48  ;;  %v1016_v53 = vrot.slane %v1015_v36, 2  ;;  %v977_v40 = vadd.f32 %v976_v16, %v975_v12  ;;  %v998_v42 = vadd.f32 %v997_v52, %v996_v19 }
 0x144   :  { %1281 = vrcp.f32 %v950_v49  ;;  %v1010_v13 = vadd.f32 %v1009_v26, %v1008_v5  ;;  %v1004_v0 = vrot.slane %v1003_v60, 1  ;;  %v1024_v27 = vadd.f32 %v1023_v9, %v1022_v59 }
 0x145   :  { %v1035_v17 = vsel %vm937_vm2, %v984_v15, %v977_v40  ;;  %v1017_v24 = vadd.f32 %v1016_v53, %v1015_v36  ;;  %v1061_v8 = vand.u32 2147483648, %v950_v49  ;;  %v1059_v43 = vand.u32 2147483647, %v950_v49 }
 0x146   :  { %v1036_v44 = vsel %vm939_vm3, %v991_v23, %v1035_v17  ;;  %v1011_v2 = vrot.slane %v1010_v13, 1  ;;  %v1005_v28 = vadd.f32 %v1004_v0, %v1003_v60  ;;  %v1025_v57 = vrot.slane %v1024_v27, 1 }
 0x147   :  { %v1037_v47 = vsel %vm941_vm4, %v998_v42, %v1036_v44  ;;  %v1018_v21 = vrot.slane %v1017_v24, 1  ;;  %vm1055_vm10 = vweird.f32 %v950_v49  ;;  %v1062_v37 = vor.u32 1.1754944e-38, %v1061_v8 }
 0x148   :  { %v1038_v18 = vsel %vm943_vm5, %v1005_v28, %v1037_v47  ;;  %v1012_v54 = vadd.f32 %v1011_v2, %v1010_v13  ;;  %v1026_v4 = vadd.f32 %v1025_v57, %v1024_v27  ;;  %vm1060_vm12 = vcmp.eq.f32.partialorder %v1059_v43, 8.507059e+37 }
 0x149   :  { %v1019_v20 = vadd.f32 %v1018_v21, %v1017_v24 }
 0x14a   :  { %v1282_v30 = vpop.eup %1281  ;;  %v1039_v34 = vsel %vm945_vm6, %v1012_v54, %v1038_v18 }
 0x14b   :  { %v1051_v29 = vmul.f32 %v1282_v30, %v950_v49  ;;  %vm1056_vm9 = vweird.f32 %v1282_v30  ;;  %v1040_v39 = vsel %vm947_vm7, %v1019_v20, %v1039_v34 }
 0x14c   :  { %vm1057_vm11 = vmor %vm1055_vm10, %vm1056_vm9  ;;  %v1041_v62 = vsel %vm949_vm8, %v1026_v4, %v1040_v39 }
 0x14d   :  { %v1052_v22 = vsub.f32 1.0, %v1051_v29 }
 0x14f   :  { %v1053_v10 = vmul.f32 %v1282_v30, %v1052_v22 }
 0x151   :  { %v1054_v11 = vadd.f32 %v1282_v30, %v1053_v10 }
 0x153   :  { %v1058_v38 = vsel %vm1057_vm11, %v1282_v30, %v1054_v11 }
 0x154   :  { %v1063_v33 = vsel %vm1060_vm12, %v1062_v37, %v1058_v38 }
 0x155   :  { %v1064_v55 = vmul.f32 %v1063_v33, %v1041_v62 }
 0x157   :  { %v1065_v6 = vmax.f32 %v1064_v55, 0.0 }
 0x159   :  { %v1066_v50 = vmin.f32 %v1065_v6, 1.0 }
 0x15b   :  { %1067 = vst [vmem:[#allocation4] sm:$0xff] %v1066_v50 }
 0x15c   :  { %1078 = dma.vmem_to_hbm [thread:$0]  %s1074_s2, 128, %s1076_s21, [#allocation5]  }
 0x15d   :  { %1307 = dma.done.wait [#allocation5], 128  }
 0x15e   :  { %1308 = vsyncadd [#allocation5], 4294967168 }
 0x15f   :  { %1083 = vsyncpa [#allocation5], 1 }

</bundles_post_ra>
